<compile_context>
chip_gen: v7x
topology: tpu7x:2x2x1
jax: 0.10.0
libtpu: 0.0.40
codegen_flags: <defaults>
</compile_context>

<pallas_src>
import functools
import math

import jax
import jax.numpy as jnp
from jax.experimental import pallas as pl
from jax.experimental.pallas import tpu as pltpu

SQRT2 = math.sqrt(2.0)
LN_EPS = 1e-5
BF16 = jnp.bfloat16


def _layernorm(x, gamma, beta):
    # PyTorch nn.LayerNorm: biased variance, eps inside rsqrt. Kept in f32.
    mean = jnp.mean(x, axis=-1, keepdims=True)
    var = jnp.mean((x - mean) ** 2, axis=-1, keepdims=True)
    return (x - mean) * jax.lax.rsqrt(var + LN_EPS) * gamma + beta


# ----------------------------------------------------------------------------
# Fused per-layer kernel: residual + PreNorm(Attention) + residual + PreNorm(FFN)
# grid = (B, L // q_tile)
# ----------------------------------------------------------------------------
def layer_kernel(x_ref, g1_ref, b1_ref, wq_ref, wk_ref, wv_ref, wout_ref,
                 bout_ref, g2_ref, b2_ref, w1_ref, fb1_ref, w2_ref, fb2_ref,
                 o_ref, k_sc, v_sc,
                 *, num_heads, dim_per_head, scale, q_tile):
    H, Dh = num_heads, dim_per_head
    qt = pl.program_id(1)

    # ---- K/V for this batch element: computed once per batch element (qt==0),
    #      cached head-major in bf16 VMEM scratch, reused by every query tile.
    #      Single dense store per tensor (no per-head scratch-store loop).
    @pl.when(qt == 0)
    def _():
        xn = _layernorm(x_ref[0], g1_ref[...], b1_ref[...]).astype(BF16)    # (L, D)
        kf = jnp.dot(xn, wk_ref[...], preferred_element_type=jnp.float32)   # (L, inner)
        vf = jnp.dot(xn, wv_ref[...], preferred_element_type=jnp.float32)
        k_sc[...] = jnp.stack(
            [kf[:, h * Dh:(h + 1) * Dh] for h in range(H)], 0).astype(BF16)
        v_sc[...] = jnp.stack(
            [vf[:, h * Dh:(h + 1) * Dh] for h in range(H)], 0).astype(BF16)

    # ---- Query tile ----------------------------------------------------------
    q0 = pl.multiple_of(qt * q_tile, q_tile)
    xq = x_ref[0, pl.ds(q0, q_tile), :]                                      # (TQ, D) f32
    xn_q = _layernorm(xq, g1_ref[...], b1_ref[...]).astype(BF16)
    qf = jnp.dot(xn_q, wq_ref[...], preferred_element_type=jnp.float32)      # (TQ, inner)
    # Head-major re-slot entirely in registers — no VMEM scratch round-trip.
    q3 = jnp.stack(
        [qf[:, h * Dh:(h + 1) * Dh] for h in range(H)], 0).astype(BF16)      # (H, TQ, Dh)

    # ---- Attention: bf16 operands, f32 accumulation, batched over heads ------
    s = jnp.einsum("hqd,hkd->hqk", q3, k_sc[...],
                   preferred_element_type=jnp.float32) * scale               # (H, TQ, L)
    s = s - jnp.max(s, axis=-1, keepdims=True)
    p = jnp.exp(s)
    p = p * pl.reciprocal(jnp.sum(p, axis=-1, keepdims=True), approx=True)   # EUP
    z = jnp.einsum("hqk,hkd->hqd", p.astype(BF16), v_sc[...],
                   preferred_element_type=jnp.float32)                       # (H, TQ, Dh)
    # head-major concat == torch z.transpose(1, 2).reshape(b, l, -1)
    z2 = jnp.concatenate([z[h] for h in range(H)], axis=-1)                  # (TQ, inner)

    attn_out = jnp.dot(z2.astype(BF16), wout_ref[...],
                       preferred_element_type=jnp.float32) + bout_ref[...]
    y = xq + attn_out                                                        # residual 1

    # ---- FFN (PreNorm), fused so y never leaves VMEM -------------------------
    yn = _layernorm(y, g2_ref[...], b2_ref[...]).astype(BF16)
    hdn = jnp.dot(yn, w1_ref[...],
                  preferred_element_type=jnp.float32) + fb1_ref[...]
    hdn = 0.5 * hdn * (1.0 + jax.lax.erf(hdn / SQRT2))   # exact GELU (nn.GELU default)
    # TODO(synk): jax.nn.gelu(approximate=True) would move this onto the EUP.
    ffn_out = jnp.dot(hdn.astype(BF16), w2_ref[...],
                      preferred_element_type=jnp.float32) + fb2_ref[...]

    o_ref[0] = (y + ffn_out).astype(o_ref.dtype)                             # residual 2


def _pick_q_tile(L):
    for t in (256, 128, 64, 32, 16, 8):
        if L % t == 0:
            return t
    return L   # TODO(synk): pad L + masked tail tile instead (e.g. ViT L=197).


def _vmem_limit_bytes():
    # Per-generation scoped-VMEM budget: ~80% of physical capacity
    # (v5e/v6e: 128 MiB -> ~102 MiB; v7x: 64 MiB -> ~51 MiB).
    try:
        cap = int(pltpu.get_tpu_info().vmem_capacity_bytes)
    except Exception:
        cap = 64 * 1024 * 1024
    cap = min(cap, 128 * 1024 * 1024)
    return int(cap * 4 // 5)


def layer_block(x, prm, *, num_heads, dim_per_head):
    B, L, D = x.shape
    inner = num_heads * dim_per_head
    Hd = prm["w1"].shape[1]
    q_tile = _pick_q_tile(L)
    n_qt = L // q_tile
    kernel = functools.partial(
        layer_kernel, num_heads=num_heads, dim_per_head=dim_per_head,
        scale=dim_per_head ** (-0.5), q_tile=q_tile)

    # Split the fused qkv weight outside the kernel (free) and pre-cast all
    # weight matrices to bf16: halves HBM traffic & VMEM residency and feeds
    # the MXU its native dtype.  Biases / LN params stay f32 (post-accum adds).
    wq = prm["wqkv"][:, :inner].astype(BF16)
    wk = prm["wqkv"][:, inner:2 * inner].astype(BF16)
    wv = prm["wqkv"][:, 2 * inner:].astype(BF16)
    wout = prm["wout"].astype(BF16)
    w1 = prm["w1"].astype(BF16)
    w2 = prm["w2"].astype(BF16)

    const = lambda b, qt: (0, 0)   # weights / params: VMEM-resident across grid
    return pl.pallas_call(
        kernel,
        out_shape=jax.ShapeDtypeStruct((B, L, D), x.dtype),
        grid=(B, n_qt),
        in_specs=[
            pl.BlockSpec((1, L, D), lambda b, qt: (b, 0, 0)),   # x: full seq per batch
            pl.BlockSpec((1, D), const),                        # ln1 gamma
            pl.BlockSpec((1, D), const),                        # ln1 beta
            pl.BlockSpec((D, inner), const),                    # wq
            pl.BlockSpec((D, inner), const),                    # wk
            pl.BlockSpec((D, inner), const),                    # wv
            pl.BlockSpec((inner, D), const),                    # wout
            pl.BlockSpec((1, D), const),                        # bout
            pl.BlockSpec((1, D), const),                        # ln2 gamma
            pl.BlockSpec((1, D), const),                        # ln2 beta
            pl.BlockSpec((D, Hd), const),                       # w1
            pl.BlockSpec((1, Hd), const),                       # b1
            pl.BlockSpec((Hd, D), const),                       # w2
            pl.BlockSpec((1, D), const),                        # b2
        ],
        out_specs=pl.BlockSpec((1, q_tile, D), lambda b, qt: (b, qt, 0)),
        scratch_shapes=[
            pltpu.VMEM((num_heads, L, dim_per_head), BF16),     # K cache (bf16)
            pltpu.VMEM((num_heads, L, dim_per_head), BF16),     # V cache (bf16)
        ],
        compiler_params=pltpu.CompilerParams(
            # qt axis must stay "arbitrary": K/V scratch persists across qt.
            dimension_semantics=("parallel", "arbitrary"),
            vmem_limit_bytes=_vmem_limit_bytes(),
        ),
    )(x, prm["ln1_g"], prm["ln1_b"], wq, wk, wv, wout, prm["bout"],
      prm["ln2_g"], prm["ln2_b"], w1, prm["b1"], w2, prm["b2"])
    # TODO(synk): with B==1 on v7x, one TensorCore idles; shard query tiles
    #             across cores (core_parallel) or stage K/V in VMEM_SHARED.


# ----------------------------------------------------------------------------
# Full Transformer forward (loop over depth in plain JAX glue)
# ----------------------------------------------------------------------------
def transformer_forward(x, layers, *, num_heads, dim_per_head):
    for prm in layers:
        x = layer_block(x, prm, num_heads=num_heads, dim_per_head=dim_per_head)
    return x


# Pure-JAX f32 reference (mirrors the PyTorch forward) for a correctness check.
def transformer_ref(x, layers, *, num_heads, dim_per_head):
    scale = dim_per_head ** (-0.5)
    for prm in layers:
        B, L, D = x.shape
        xn = _layernorm(x, prm["ln1_g"], prm["ln1_b"])
        qkv = xn @ prm["wqkv"]
        qkv = qkv.reshape(B, L, 3, num_heads, dim_per_head).transpose(2, 0, 3, 1, 4)
        q, k, v = qkv[0], qkv[1], qkv[2]
        attn = jax.nn.softmax(jnp.einsum("bhld,bhmd->bhlm", q, k) * scale, axis=-1)
        z = jnp.einsum("bhlm,bhmd->bhld", attn, v)
        z = z.transpose(0, 2, 1, 3).reshape(B, L, -1)
        x = x + (z @ prm["wout"] + prm["bout"])

        xn = _layernorm(x, prm["ln2_g"], prm["ln2_b"])
        h = xn @ prm["w1"] + prm["b1"]
        h = 0.5 * h * (1.0 + jax.lax.erf(h / SQRT2))
        x = x + (h @ prm["w2"] + prm["b2"])
    return x


def init_params(key, depth, dim, mlp_dim, num_heads, dim_per_head):
    inner = num_heads * dim_per_head
    layers = []
    for _ in range(depth):
        key, *ks = jax.random.split(key, 7)
        layers.append(dict(
            ln1_g=jnp.ones((1, dim), jnp.float32),
            ln1_b=jnp.zeros((1, dim), jnp.float32),
            wqkv=0.05 * jax.random.normal(ks[0], (dim, 3 * inner), jnp.float32),
            wout=0.05 * jax.random.normal(ks[1], (inner, dim), jnp.float32),
            bout=0.05 * jax.random.normal(ks[2], (1, dim), jnp.float32),
            ln2_g=jnp.ones((1, dim), jnp.float32),
            ln2_b=jnp.zeros((1, dim), jnp.float32),
            w1=0.05 * jax.random.normal(ks[3], (dim, mlp_dim), jnp.float32),
            b1=0.05 * jax.random.normal(ks[4], (1, mlp_dim), jnp.float32),
            w2=0.05 * jax.random.normal(ks[5], (mlp_dim, dim), jnp.float32),
            b2=jnp.zeros((1, dim), jnp.float32),
        ))
    return layers


if __name__ == "__main__":
    # Small, forward-consistent shapes.
    B, L, DIM = 2, 8, 32
    MLP_DIM = 64
    DEPTH = 2
    NUM_HEADS = 2
    DIM_PER_HEAD = 16

    key = jax.random.PRNGKey(0)
    kx, kp = jax.random.split(key)
    x = jax.random.normal(kx, (B, L, DIM), jnp.float32)
    layers = init_params(kp, DEPTH, DIM, MLP_DIM, NUM_HEADS, DIM_PER_HEAD)

    out = transformer_forward(x, layers, num_heads=NUM_HEADS, dim_per_head=DIM_PER_HEAD)
    out = jax.block_until_ready(out)

    ref = transformer_ref(x, layers, num_heads=NUM_HEADS, dim_per_head=DIM_PER_HEAD)
    assert out.shape == (B, L, DIM)
    # bf16 matmul operands / bf16 weight storage (f32 accumulation): tolerance
    # is intentionally looser than the previous all-f32 version's 1e-4.
    assert jnp.allclose(out, ref, rtol=2e-2, atol=2e-2), "mismatch vs reference"

    print("KERNEL_OK")
</pallas_src>

<mosaic_0001>
module attributes {stable_mosaic.version = 11 : i64} {
  func.func @layer_kernel(%arg0: i32, %arg1: i32, %arg2: memref<1x8x32xf32, #tpu.memory_space<vmem>>, %arg3: memref<1x32xf32, #tpu.memory_space<vmem>>, %arg4: memref<1x32xf32, #tpu.memory_space<vmem>>, %arg5: memref<32x32xbf16, #tpu.memory_space<vmem>>, %arg6: memref<32x32xbf16, #tpu.memory_space<vmem>>, %arg7: memref<32x32xbf16, #tpu.memory_space<vmem>>, %arg8: memref<32x32xbf16, #tpu.memory_space<vmem>>, %arg9: memref<1x32xf32, #tpu.memory_space<vmem>>, %arg10: memref<1x32xf32, #tpu.memory_space<vmem>>, %arg11: memref<1x32xf32, #tpu.memory_space<vmem>>, %arg12: memref<32x64xbf16, #tpu.memory_space<vmem>>, %arg13: memref<1x64xf32, #tpu.memory_space<vmem>>, %arg14: memref<64x32xbf16, #tpu.memory_space<vmem>>, %arg15: memref<1x32xf32, #tpu.memory_space<vmem>>, %arg16: memref<1x8x32xf32, #tpu.memory_space<vmem>>, %arg17: memref<2x8x16xbf16, #tpu.memory_space<vmem>>, %arg18: memref<2x8x16xbf16, #tpu.memory_space<vmem>>) attributes {dimension_semantics = [#tpu.dimension_semantics<parallel>, #tpu.dimension_semantics<arbitrary>], iteration_bounds = array<i64: 2, 1>, scalar_prefetch = 0 : i64, scratch_operands = 2 : i64, tpu.core_type = #tpu.core_type<tc>, window_params = [{transform_indices = @transform_0, window_bounds = array<i64: 1, 8, 32>}, {pipeline_mode = #tpu.pipeline_mode<synchronous>, transform_indices = @transform_1, window_bounds = array<i64: 1, 32>}, {pipeline_mode = #tpu.pipeline_mode<synchronous>, transform_indices = @transform_2, window_bounds = array<i64: 1, 32>}, {pipeline_mode = #tpu.pipeline_mode<synchronous>, transform_indices = @transform_3, window_bounds = array<i64: 32, 32>}, {pipeline_mode = #tpu.pipeline_mode<synchronous>, transform_indices = @transform_4, window_bounds = array<i64: 32, 32>}, {pipeline_mode = #tpu.pipeline_mode<synchronous>, transform_indices = @transform_5, window_bounds = array<i64: 32, 32>}, {pipeline_mode = #tpu.pipeline_mode<synchronous>, transform_indices = @transform_6, window_bounds = array<i64: 32, 32>}, {pipeline_mode = #tpu.pipeline_mode<synchronous>, transform_indices = @transform_7, window_bounds = array<i64: 1, 32>}, {pipeline_mode = #tpu.pipeline_mode<synchronous>, transform_indices = @transform_8, window_bounds = array<i64: 1, 32>}, {pipeline_mode = #tpu.pipeline_mode<synchronous>, transform_indices = @transform_9, window_bounds = array<i64: 1, 32>}, {pipeline_mode = #tpu.pipeline_mode<synchronous>, transform_indices = @transform_10, window_bounds = array<i64: 32, 64>}, {pipeline_mode = #tpu.pipeline_mode<synchronous>, transform_indices = @transform_11, window_bounds = array<i64: 1, 64>}, {pipeline_mode = #tpu.pipeline_mode<synchronous>, transform_indices = @transform_12, window_bounds = array<i64: 64, 32>}, {pipeline_mode = #tpu.pipeline_mode<synchronous>, transform_indices = @transform_13, window_bounds = array<i64: 1, 32>}, {transform_indices = @transform_14, window_bounds = array<i64: 1, 8, 32>}]} {
    %c0_i32 = arith.constant 0 : i32
    %0 = arith.cmpi eq, %arg1, %c0_i32 : i32
    %1 = arith.extui %0 : i1 to i32
    %c0_i32_0 = arith.constant 0 : i32
    %2 = arith.cmpi ne, %1, %c0_i32_0 : i32
    scf.if %2 {
      %c0_54 = arith.constant 0 : index
      %c0_55 = arith.constant 0 : index
      %c0_56 = arith.constant 0 : index
      %118 = vector.load %arg2[%c0_54, %c0_55, %c0_56] : memref<1x8x32xf32, #tpu.memory_space<vmem>>, vector<1x8x32xf32>
      %119 = vector.shape_cast %118 : vector<1x8x32xf32> to vector<8x32xf32>
      %c0_57 = arith.constant 0 : index
      %c0_58 = arith.constant 0 : index
      %120 = vector.load %arg3[%c0_57, %c0_58] : memref<1x32xf32, #tpu.memory_space<vmem>>, vector<1x32xf32>
      %c0_59 = arith.constant 0 : index
      %c0_60 = arith.constant 0 : index
      %121 = vector.load %arg4[%c0_59, %c0_60] : memref<1x32xf32, #tpu.memory_space<vmem>>, vector<1x32xf32>
      %cst_61 = arith.constant dense<0.000000e+00> : vector<8xf32>
      %122 = vector.multi_reduction <add>, %119, %cst_61 [1] : vector<8x32xf32> to vector<8xf32>
      %123 = vector.shape_cast %122 : vector<8xf32> to vector<8x1xf32>
      %cst_62 = arith.constant 3.200000e+01 : f32
      %124 = vector.broadcast %cst_62 : f32 to vector<8x1xf32>
      %125 = arith.divf %123, %124 : vector<8x1xf32>
      %126 = vector.broadcast %125 : vector<8x1xf32> to vector<8x32xf32>
      %127 = arith.subf %119, %126 : vector<8x32xf32>
      %128 = arith.mulf %127, %127 : vector<8x32xf32>
      %cst_63 = arith.constant dense<0.000000e+00> : vector<8xf32>
      %129 = vector.multi_reduction <add>, %128, %cst_63 [1] : vector<8x32xf32> to vector<8xf32>
      %130 = vector.shape_cast %129 : vector<8xf32> to vector<8x1xf32>
      %cst_64 = arith.constant 3.200000e+01 : f32
      %131 = vector.broadcast %cst_64 : f32 to vector<8x1xf32>
      %132 = arith.divf %130, %131 : vector<8x1xf32>
      %133 = vector.broadcast %125 : vector<8x1xf32> to vector<8x32xf32>
      %134 = arith.subf %119, %133 : vector<8x32xf32>
      %cst_65 = arith.constant 9.99999974E-6 : f32
      %135 = vector.broadcast %cst_65 : f32 to vector<8x1xf32>
      %136 = arith.addf %132, %135 : vector<8x1xf32>
      %137 = math.rsqrt %136 : vector<8x1xf32>
      %138 = vector.broadcast %137 : vector<8x1xf32> to vector<8x32xf32>
      %139 = arith.mulf %134, %138 : vector<8x32xf32>
      %140 = vector.broadcast %120 : vector<1x32xf32> to vector<8x32xf32>
      %141 = arith.mulf %139, %140 : vector<8x32xf32>
      %142 = vector.broadcast %121 : vector<1x32xf32> to vector<8x32xf32>
      %143 = arith.addf %141, %142 : vector<8x32xf32>
      %144 = arith.truncf %143 : vector<8x32xf32> to vector<8x32xbf16>
      %c0_66 = arith.constant 0 : index
      %c0_67 = arith.constant 0 : index
      %145 = vector.load %arg6[%c0_66, %c0_67] : memref<32x32xbf16, #tpu.memory_space<vmem>>, vector<32x32xbf16>
      %cst_68 = arith.constant dense<0.000000e+00> : vector<8x32xf32>
      %146 = tpu.matmul %144, %145, %cst_68 {dimension_numbers = #tpu.dot_dimension_numbers<[1], [0], [0], [1], [0, 0, 1, 1], [], []>} : vector<8x32xbf16>, vector<32x32xbf16>, vector<8x32xf32> -> vector<8x32xf32>
      %c0_69 = arith.constant 0 : index
      %c0_70 = arith.constant 0 : index
      %147 = vector.load %arg7[%c0_69, %c0_70] : memref<32x32xbf16, #tpu.memory_space<vmem>>, vector<32x32xbf16>
      %cst_71 = arith.constant dense<0.000000e+00> : vector<8x32xf32>
      %148 = tpu.matmul %144, %147, %cst_71 {dimension_numbers = #tpu.dot_dimension_numbers<[1], [0], [0], [1], [0, 0, 1, 1], [], []>} : vector<8x32xbf16>, vector<32x32xbf16>, vector<8x32xf32> -> vector<8x32xf32>
      %149 = vector.extract_strided_slice %146 {offsets = [0, 0], sizes = [8, 16], strides = [1, 1]} : vector<8x32xf32> to vector<8x16xf32>
      %150 = vector.extract_strided_slice %146 {offsets = [0, 16], sizes = [8, 16], strides = [1, 1]} : vector<8x32xf32> to vector<8x16xf32>
      %151 = vector.shape_cast %149 : vector<8x16xf32> to vector<1x8x16xf32>
      %152 = vector.shape_cast %150 : vector<8x16xf32> to vector<1x8x16xf32>
      %153 = tpu.concatenate %151, %152 in 0 : vector<1x8x16xf32>, vector<1x8x16xf32> -> vector<2x8x16xf32>
      %154 = arith.truncf %153 : vector<2x8x16xf32> to vector<2x8x16xbf16>
      %c0_72 = arith.constant 0 : index
      %c0_73 = arith.constant 0 : index
      %c0_74 = arith.constant 0 : index
      %155 = vector.load %arg17[%c0_72, %c0_73, %c0_74] : memref<2x8x16xbf16, #tpu.memory_space<vmem>>, vector<2x8x16xbf16>
      tpu.vector_store %arg17[%c0_72, %c0_73, %c0_74], %154 {strides = array<i32>} : memref<2x8x16xbf16, #tpu.memory_space<vmem>>, vector<2x8x16xbf16>,
      %156 = vector.extract_strided_slice %148 {offsets = [0, 0], sizes = [8, 16], strides = [1, 1]} : vector<8x32xf32> to vector<8x16xf32>
      %157 = vector.extract_strided_slice %148 {offsets = [0, 16], sizes = [8, 16], strides = [1, 1]} : vector<8x32xf32> to vector<8x16xf32>
      %158 = vector.shape_cast %156 : vector<8x16xf32> to vector<1x8x16xf32>
      %159 = vector.shape_cast %157 : vector<8x16xf32> to vector<1x8x16xf32>
      %160 = tpu.concatenate %158, %159 in 0 : vector<1x8x16xf32>, vector<1x8x16xf32> -> vector<2x8x16xf32>
      %161 = arith.truncf %160 : vector<2x8x16xf32> to vector<2x8x16xbf16>
      %c0_75 = arith.constant 0 : index
      %c0_76 = arith.constant 0 : index
      %c0_77 = arith.constant 0 : index
      %162 = vector.load %arg18[%c0_75, %c0_76, %c0_77] : memref<2x8x16xbf16, #tpu.memory_space<vmem>>, vector<2x8x16xbf16>
      tpu.vector_store %arg18[%c0_75, %c0_76, %c0_77], %161 {strides = array<i32>} : memref<2x8x16xbf16, #tpu.memory_space<vmem>>, vector<2x8x16xbf16>,
    } else {
    }
    %c8_i32 = arith.constant 8 : i32
    %3 = arith.muli %arg1, %c8_i32 : i32
    %4 = tpu.assume_multiple %3, 8 : i32
    %c0 = arith.constant 0 : index
    %5 = arith.index_cast %4 : i32 to index
    %c0_1 = arith.constant 0 : index
    %6 = vector.load %arg2[%c0, %5, %c0_1] : memref<1x8x32xf32, #tpu.memory_space<vmem>>, vector<1x8x32xf32>
    %7 = vector.shape_cast %6 : vector<1x8x32xf32> to vector<8x32xf32>
    %c0_2 = arith.constant 0 : index
    %c0_3 = arith.constant 0 : index
    %8 = vector.load %arg3[%c0_2, %c0_3] : memref<1x32xf32, #tpu.memory_space<vmem>>, vector<1x32xf32>
    %c0_4 = arith.constant 0 : index
    %c0_5 = arith.constant 0 : index
    %9 = vector.load %arg4[%c0_4, %c0_5] : memref<1x32xf32, #tpu.memory_space<vmem>>, vector<1x32xf32>
    %cst = arith.constant dense<0.000000e+00> : vector<8xf32>
    %10 = vector.multi_reduction <add>, %7, %cst [1] : vector<8x32xf32> to vector<8xf32>
    %11 = vector.shape_cast %10 : vector<8xf32> to vector<8x1xf32>
    %cst_6 = arith.constant 3.200000e+01 : f32
    %12 = vector.broadcast %cst_6 : f32 to vector<8x1xf32>
    %13 = arith.divf %11, %12 : vector<8x1xf32>
    %14 = vector.broadcast %13 : vector<8x1xf32> to vector<8x32xf32>
    %15 = arith.subf %7, %14 : vector<8x32xf32>
    %16 = arith.mulf %15, %15 : vector<8x32xf32>
    %cst_7 = arith.constant dense<0.000000e+00> : vector<8xf32>
    %17 = vector.multi_reduction <add>, %16, %cst_7 [1] : vector<8x32xf32> to vector<8xf32>
    %18 = vector.shape_cast %17 : vector<8xf32> to vector<8x1xf32>
    %cst_8 = arith.constant 3.200000e+01 : f32
    %19 = vector.broadcast %cst_8 : f32 to vector<8x1xf32>
    %20 = arith.divf %18, %19 : vector<8x1xf32>
    %21 = vector.broadcast %13 : vector<8x1xf32> to vector<8x32xf32>
    %22 = arith.subf %7, %21 : vector<8x32xf32>
    %cst_9 = arith.constant 9.99999974E-6 : f32
    %23 = vector.broadcast %cst_9 : f32 to vector<8x1xf32>
    %24 = arith.addf %20, %23 : vector<8x1xf32>
    %25 = math.rsqrt %24 : vector<8x1xf32>
    %26 = vector.broadcast %25 : vector<8x1xf32> to vector<8x32xf32>
    %27 = arith.mulf %22, %26 : vector<8x32xf32>
    %28 = vector.broadcast %8 : vector<1x32xf32> to vector<8x32xf32>
    %29 = arith.mulf %27, %28 : vector<8x32xf32>
    %30 = vector.broadcast %9 : vector<1x32xf32> to vector<8x32xf32>
    %31 = arith.addf %29, %30 : vector<8x32xf32>
    %32 = arith.truncf %31 : vector<8x32xf32> to vector<8x32xbf16>
    %c0_10 = arith.constant 0 : index
    %c0_11 = arith.constant 0 : index
    %33 = vector.load %arg5[%c0_10, %c0_11] : memref<32x32xbf16, #tpu.memory_space<vmem>>, vector<32x32xbf16>
    %cst_12 = arith.constant dense<0.000000e+00> : vector<8x32xf32>
    %34 = tpu.matmul %32, %33, %cst_12 {dimension_numbers = #tpu.dot_dimension_numbers<[1], [0], [0], [1], [0, 0, 1, 1], [], []>} : vector<8x32xbf16>, vector<32x32xbf16>, vector<8x32xf32> -> vector<8x32xf32>
    %35 = vector.extract_strided_slice %34 {offsets = [0, 0], sizes = [8, 16], strides = [1, 1]} : vector<8x32xf32> to vector<8x16xf32>
    %36 = vector.extract_strided_slice %34 {offsets = [0, 16], sizes = [8, 16], strides = [1, 1]} : vector<8x32xf32> to vector<8x16xf32>
    %37 = vector.shape_cast %35 : vector<8x16xf32> to vector<1x8x16xf32>
    %38 = vector.shape_cast %36 : vector<8x16xf32> to vector<1x8x16xf32>
    %39 = tpu.concatenate %37, %38 in 0 : vector<1x8x16xf32>, vector<1x8x16xf32> -> vector<2x8x16xf32>
    %40 = arith.truncf %39 : vector<2x8x16xf32> to vector<2x8x16xbf16>
    %c0_13 = arith.constant 0 : index
    %c0_14 = arith.constant 0 : index
    %c0_15 = arith.constant 0 : index
    %41 = vector.load %arg17[%c0_13, %c0_14, %c0_15] : memref<2x8x16xbf16, #tpu.memory_space<vmem>>, vector<2x8x16xbf16>
    "tpu.trace_start"() <{level = 10 : i32, message = "hqd,hkd->hqk"}> : () -> ()
    %cst_16 = arith.constant dense<0.000000e+00> : vector<2x8x8xf32>
    %42 = tpu.matmul %40, %41, %cst_16 {dimension_numbers = #tpu.dot_dimension_numbers<[2], [2], [1], [1], [0, 0, 0, 1, 1, 1], [0], [0]>} : vector<2x8x16xbf16>, vector<2x8x16xbf16>, vector<2x8x8xf32> -> vector<2x8x8xf32>
    "tpu.trace_stop"() : () -> ()
    %cst_17 = arith.constant 2.500000e-01 : f32
    %43 = vector.broadcast %cst_17 : f32 to vector<2x8x8xf32>
    %44 = arith.mulf %42, %43 : vector<2x8x8xf32>
    %cst_18 = arith.constant dense<0xFF800000> : vector<2x8xf32>
    %45 = vector.multi_reduction <maximumf>, %44, %cst_18 [2] : vector<2x8x8xf32> to vector<2x8xf32>
    %46 = vector.shape_cast %45 : vector<2x8xf32> to vector<2x8x1xf32>
    %47 = vector.broadcast %46 : vector<2x8x1xf32> to vector<2x8x8xf32>
    %48 = arith.subf %44, %47 : vector<2x8x8xf32>
    %49 = math.exp %48 : vector<2x8x8xf32>
    %cst_19 = arith.constant dense<0.000000e+00> : vector<2x8xf32>
    %50 = vector.multi_reduction <add>, %49, %cst_19 [2] : vector<2x8x8xf32> to vector<2x8xf32>
    %51 = vector.shape_cast %50 : vector<2x8xf32> to vector<2x8x1xf32>
    %52 = tpu.reciprocal %51 {approx = true} : vector<2x8x1xf32> -> vector<2x8x1xf32>
    %53 = vector.broadcast %52 : vector<2x8x1xf32> to vector<2x8x8xf32>
    %54 = arith.mulf %49, %53 : vector<2x8x8xf32>
    %55 = arith.truncf %54 : vector<2x8x8xf32> to vector<2x8x8xbf16>
    %c0_20 = arith.constant 0 : index
    %c0_21 = arith.constant 0 : index
    %c0_22 = arith.constant 0 : index
    %56 = vector.load %arg18[%c0_20, %c0_21, %c0_22] : memref<2x8x16xbf16, #tpu.memory_space<vmem>>, vector<2x8x16xbf16>
    "tpu.trace_start"() <{level = 10 : i32, message = "hqk,hkd->hqd"}> : () -> ()
    %cst_23 = arith.constant dense<0.000000e+00> : vector<2x8x16xf32>
    %57 = tpu.matmul %55, %56, %cst_23 {dimension_numbers = #tpu.dot_dimension_numbers<[2], [1], [1], [2], [0, 0, 0, 1, 1, 2], [0], [0]>} : vector<2x8x8xbf16>, vector<2x8x16xbf16>, vector<2x8x16xf32> -> vector<2x8x16xf32>
    "tpu.trace_stop"() : () -> ()
    %58 = vector.extract_strided_slice %57 {offsets = [0, 0, 0], sizes = [1, 8, 16], strides = [1, 1, 1]} : vector<2x8x16xf32> to vector<1x8x16xf32>
    %59 = vector.shape_cast %58 : vector<1x8x16xf32> to vector<8x16xf32>
    %60 = vector.extract_strided_slice %57 {offsets = [1, 0, 0], sizes = [1, 8, 16], strides = [1, 1, 1]} : vector<2x8x16xf32> to vector<1x8x16xf32>
    %61 = vector.shape_cast %60 : vector<1x8x16xf32> to vector<8x16xf32>
    %62 = tpu.concatenate %59, %61 in 1 : vector<8x16xf32>, vector<8x16xf32> -> vector<8x32xf32>
    %63 = arith.truncf %62 : vector<8x32xf32> to vector<8x32xbf16>
    %c0_24 = arith.constant 0 : index
    %c0_25 = arith.constant 0 : index
    %64 = vector.load %arg8[%c0_24, %c0_25] : memref<32x32xbf16, #tpu.memory_space<vmem>>, vector<32x32xbf16>
    %cst_26 = arith.constant dense<0.000000e+00> : vector<8x32xf32>
    %65 = tpu.matmul %63, %64, %cst_26 {dimension_numbers = #tpu.dot_dimension_numbers<[1], [0], [0], [1], [0, 0, 1, 1], [], []>} : vector<8x32xbf16>, vector<32x32xbf16>, vector<8x32xf32> -> vector<8x32xf32>
    %c0_27 = arith.constant 0 : index
    %c0_28 = arith.constant 0 : index
    %66 = vector.load %arg9[%c0_27, %c0_28] : memref<1x32xf32, #tpu.memory_space<vmem>>, vector<1x32xf32>
    %67 = vector.broadcast %66 : vector<1x32xf32> to vector<8x32xf32>
    %68 = arith.addf %65, %67 : vector<8x32xf32>
    %69 = arith.addf %7, %68 : vector<8x32xf32>
    %c0_29 = arith.constant 0 : index
    %c0_30 = arith.constant 0 : index
    %70 = vector.load %arg10[%c0_29, %c0_30] : memref<1x32xf32, #tpu.memory_space<vmem>>, vector<1x32xf32>
    %c0_31 = arith.constant 0 : index
    %c0_32 = arith.constant 0 : index
    %71 = vector.load %arg11[%c0_31, %c0_32] : memref<1x32xf32, #tpu.memory_space<vmem>>, vector<1x32xf32>
    %cst_33 = arith.constant dense<0.000000e+00> : vector<8xf32>
    %72 = vector.multi_reduction <add>, %69, %cst_33 [1] : vector<8x32xf32> to vector<8xf32>
    %73 = vector.shape_cast %72 : vector<8xf32> to vector<8x1xf32>
    %cst_34 = arith.constant 3.200000e+01 : f32
    %74 = vector.broadcast %cst_34 : f32 to vector<8x1xf32>
    %75 = arith.divf %73, %74 : vector<8x1xf32>
    %76 = vector.broadcast %75 : vector<8x1xf32> to vector<8x32xf32>
    %77 = arith.subf %69, %76 : vector<8x32xf32>
    %78 = arith.mulf %77, %77 : vector<8x32xf32>
    %cst_35 = arith.constant dense<0.000000e+00> : vector<8xf32>
    %79 = vector.multi_reduction <add>, %78, %cst_35 [1] : vector<8x32xf32> to vector<8xf32>
    %80 = vector.shape_cast %79 : vector<8xf32> to vector<8x1xf32>
    %cst_36 = arith.constant 3.200000e+01 : f32
    %81 = vector.broadcast %cst_36 : f32 to vector<8x1xf32>
    %82 = arith.divf %80, %81 : vector<8x1xf32>
    %83 = vector.broadcast %75 : vector<8x1xf32> to vector<8x32xf32>
    %84 = arith.subf %69, %83 : vector<8x32xf32>
    %cst_37 = arith.constant 9.99999974E-6 : f32
    %85 = vector.broadcast %cst_37 : f32 to vector<8x1xf32>
    %86 = arith.addf %82, %85 : vector<8x1xf32>
    %87 = math.rsqrt %86 : vector<8x1xf32>
    %88 = vector.broadcast %87 : vector<8x1xf32> to vector<8x32xf32>
    %89 = arith.mulf %84, %88 : vector<8x32xf32>
    %90 = vector.broadcast %70 : vector<1x32xf32> to vector<8x32xf32>
    %91 = arith.mulf %89, %90 : vector<8x32xf32>
    %92 = vector.broadcast %71 : vector<1x32xf32> to vector<8x32xf32>
    %93 = arith.addf %91, %92 : vector<8x32xf32>
    %94 = arith.truncf %93 : vector<8x32xf32> to vector<8x32xbf16>
    %c0_38 = arith.constant 0 : index
    %c0_39 = arith.constant 0 : index
    %95 = vector.load %arg12[%c0_38, %c0_39] : memref<32x64xbf16, #tpu.memory_space<vmem>>, vector<32x64xbf16>
    %cst_40 = arith.constant dense<0.000000e+00> : vector<8x64xf32>
    %96 = tpu.matmul %94, %95, %cst_40 {dimension_numbers = #tpu.dot_dimension_numbers<[1], [0], [0], [1], [0, 0, 1, 1], [], []>} : vector<8x32xbf16>, vector<32x64xbf16>, vector<8x64xf32> -> vector<8x64xf32>
    %c0_41 = arith.constant 0 : index
    %c0_42 = arith.constant 0 : index
    %97 = vector.load %arg13[%c0_41, %c0_42] : memref<1x64xf32, #tpu.memory_space<vmem>>, vector<1x64xf32>
    %98 = vector.broadcast %97 : vector<1x64xf32> to vector<8x64xf32>
    %99 = arith.addf %96, %98 : vector<8x64xf32>
    %cst_43 = arith.constant 5.000000e-01 : f32
    %100 = vector.broadcast %cst_43 : f32 to vector<8x64xf32>
    %101 = arith.mulf %100, %99 : vector<8x64xf32>
    %cst_44 = arith.constant 1.41421354 : f32
    %102 = vector.broadcast %cst_44 : f32 to vector<8x64xf32>
    %103 = arith.divf %99, %102 : vector<8x64xf32>
    %104 = math.erf %103 : vector<8x64xf32>
    %cst_45 = arith.constant 1.000000e+00 : f32
    %105 = vector.broadcast %cst_45 : f32 to vector<8x64xf32>
    %106 = arith.addf %105, %104 : vector<8x64xf32>
    %107 = arith.mulf %101, %106 : vector<8x64xf32>
    %108 = arith.truncf %107 : vector<8x64xf32> to vector<8x64xbf16>
    %c0_46 = arith.constant 0 : index
    %c0_47 = arith.constant 0 : index
    %109 = vector.load %arg14[%c0_46, %c0_47] : memref<64x32xbf16, #tpu.memory_space<vmem>>, vector<64x32xbf16>
    %cst_48 = arith.constant dense<0.000000e+00> : vector<8x32xf32>
    %110 = tpu.matmul %108, %109, %cst_48 {dimension_numbers = #tpu.dot_dimension_numbers<[1], [0], [0], [1], [0, 0, 1, 1], [], []>} : vector<8x64xbf16>, vector<64x32xbf16>, vector<8x32xf32> -> vector<8x32xf32>
    %c0_49 = arith.constant 0 : index
    %c0_50 = arith.constant 0 : index
    %111 = vector.load %arg15[%c0_49, %c0_50] : memref<1x32xf32, #tpu.memory_space<vmem>>, vector<1x32xf32>
    %112 = vector.broadcast %111 : vector<1x32xf32> to vector<8x32xf32>
    %113 = arith.addf %110, %112 : vector<8x32xf32>
    %114 = arith.addf %69, %113 : vector<8x32xf32>
    %c0_51 = arith.constant 0 : index
    %c0_52 = arith.constant 0 : index
    %c0_53 = arith.constant 0 : index
    %115 = vector.load %arg16[%c0_51, %c0_52, %c0_53] : memref<1x8x32xf32, #tpu.memory_space<vmem>>, vector<1x8x32xf32>
    %116 = vector.shape_cast %115 : vector<1x8x32xf32> to vector<8x32xf32>
    %117 = vector.shape_cast %114 : vector<8x32xf32> to vector<1x8x32xf32>
    tpu.vector_store %arg16[%c0_51, %c0_52, %c0_53], %117 {strides = array<i32>} : memref<1x8x32xf32, #tpu.memory_space<vmem>>, vector<1x8x32xf32>,
    return
  }
  func.func @transform_0(%arg0: i32, %arg1: i32) -> (i32, i32, i32) {
    %c0_i32 = arith.constant 0 : i32
    %c0_i32_0 = arith.constant 0 : i32
    %c0_i32_1 = arith.constant 0 : i32
    return %arg0, %c0_i32, %c0_i32_0 : i32, i32, i32
  }
  func.func @transform_1(%arg0: i32, %arg1: i32) -> (i32, i32) {
    %c0_i32 = arith.constant 0 : i32
    %c0_i32_0 = arith.constant 0 : i32
    %c0_i32_1 = arith.constant 0 : i32
    return %c0_i32, %c0_i32_0 : i32, i32
  }
  func.func @transform_2(%arg0: i32, %arg1: i32) -> (i32, i32) {
    %c0_i32 = arith.constant 0 : i32
    %c0_i32_0 = arith.constant 0 : i32
    %c0_i32_1 = arith.constant 0 : i32
    return %c0_i32, %c0_i32_0 : i32, i32
  }
  func.func @transform_3(%arg0: i32, %arg1: i32) -> (i32, i32) {
    %c0_i32 = arith.constant 0 : i32
    %c0_i32_0 = arith.constant 0 : i32
    %c0_i32_1 = arith.constant 0 : i32
    return %c0_i32, %c0_i32_0 : i32, i32
  }
  func.func @transform_4(%arg0: i32, %arg1: i32) -> (i32, i32) {
    %c0_i32 = arith.constant 0 : i32
    %c0_i32_0 = arith.constant 0 : i32
    %c0_i32_1 = arith.constant 0 : i32
    return %c0_i32, %c0_i32_0 : i32, i32
  }
  func.func @transform_5(%arg0: i32, %arg1: i32) -> (i32, i32) {
    %c0_i32 = arith.constant 0 : i32
    %c0_i32_0 = arith.constant 0 : i32
    %c0_i32_1 = arith.constant 0 : i32
    return %c0_i32, %c0_i32_0 : i32, i32
  }
  func.func @transform_6(%arg0: i32, %arg1: i32) -> (i32, i32) {
    %c0_i32 = arith.constant 0 : i32
    %c0_i32_0 = arith.constant 0 : i32
    %c0_i32_1 = arith.constant 0 : i32
    return %c0_i32, %c0_i32_0 : i32, i32
  }
  func.func @transform_7(%arg0: i32, %arg1: i32) -> (i32, i32) {
    %c0_i32 = arith.constant 0 : i32
    %c0_i32_0 = arith.constant 0 : i32
    %c0_i32_1 = arith.constant 0 : i32
    return %c0_i32, %c0_i32_0 : i32, i32
  }
  func.func @transform_8(%arg0: i32, %arg1: i32) -> (i32, i32) {
    %c0_i32 = arith.constant 0 : i32
    %c0_i32_0 = arith.constant 0 : i32
    %c0_i32_1 = arith.constant 0 : i32
    return %c0_i32, %c0_i32_0 : i32, i32
  }
  func.func @transform_9(%arg0: i32, %arg1: i32) -> (i32, i32) {
    %c0_i32 = arith.constant 0 : i32
    %c0_i32_0 = arith.constant 0 : i32
    %c0_i32_1 = arith.constant 0 : i32
    return %c0_i32, %c0_i32_0 : i32, i32
  }
  func.func @transform_10(%arg0: i32, %arg1: i32) -> (i32, i32) {
    %c0_i32 = arith.constant 0 : i32
    %c0_i32_0 = arith.constant 0 : i32
    %c0_i32_1 = arith.constant 0 : i32
    return %c0_i32, %c0_i32_0 : i32, i32
  }
  func.func @transform_11(%arg0: i32, %arg1: i32) -> (i32, i32) {
    %c0_i32 = arith.constant 0 : i32
    %c0_i32_0 = arith.constant 0 : i32
    %c0_i32_1 = arith.constant 0 : i32
    return %c0_i32, %c0_i32_0 : i32, i32
  }
  func.func @transform_12(%arg0: i32, %arg1: i32) -> (i32, i32) {
    %c0_i32 = arith.constant 0 : i32
    %c0_i32_0 = arith.constant 0 : i32
    %c0_i32_1 = arith.constant 0 : i32
    return %c0_i32, %c0_i32_0 : i32, i32
  }
  func.func @transform_13(%arg0: i32, %arg1: i32) -> (i32, i32) {
    %c0_i32 = arith.constant 0 : i32
    %c0_i32_0 = arith.constant 0 : i32
    %c0_i32_1 = arith.constant 0 : i32
    return %c0_i32, %c0_i32_0 : i32, i32
  }
  func.func @transform_14(%arg0: i32, %arg1: i32) -> (i32, i32, i32) {
    %c0_i32 = arith.constant 0 : i32
    %c0_i32_0 = arith.constant 0 : i32
    return %arg0, %arg1, %c0_i32 : i32, i32, i32
  }
}

</mosaic_0001>

<bundles_post_ra>
// kernel: tpu_custom_call.1
= control target key start
LH: loop header
LB: loop body
LE: loop exit
PB: predicated region body
PF: predicated region fallthrough
CT: control target
= control target key end

     0   :  { %s2420_s0 = inlined_call_operand.vmem [shape: f32[2,8,32], index: 0, kind: input, shape index: {}]   ;;  %s2421_s1 = inlined_call_operand.vmem [shape: f32[1,32], index: 1, kind: input, shape index: {}]   ;;  %s2422_s2 = inlined_call_operand.vmem [shape: f32[1,32], index: 2, kind: input, shape index: {}]   ;;  %s2423_s3 = inlined_call_operand.vmem [shape: bf16[32,32], index: 3, kind: input, shape index: {}]   ;;  %s2424_s4 = inlined_call_operand.vmem [shape: bf16[32,32], index: 4, kind: input, shape index: {}]   ;;  %s2425_s5 = inlined_call_operand.hbm [shape: bf16[32,32], index: 5, kind: input, shape index: {}]   ;;  %s2426_s6 = inlined_call_operand.hbm [shape: bf16[32,32], index: 6, kind: input, shape index: {}]   ;;  %s2427_s7 = inlined_call_operand.hbm [shape: f32[1,32], index: 7, kind: input, shape index: {}]   ;;  %s2428_s8 = inlined_call_operand.hbm [shape: f32[1,32], index: 8, kind: input, shape index: {}]   ;;  %s2429_s9 = inlined_call_operand.hbm [shape: f32[1,32], index: 9, kind: input, shape index: {}]   ;;  %s2430_s10 = inlined_call_operand.vmem [shape: bf16[32,64], index: 10, kind: input, shape index: {}]   ;;  %s2431_s11 = inlined_call_operand.vmem [shape: f32[1,64], index: 11, kind: input, shape index: {}]   ;;  %s2432_s12 = inlined_call_operand.vmem [shape: bf16[64,32], index: 12, kind: input, shape index: {}]   ;;  %s2433_s13 = inlined_call_operand.vmem [shape: f32[1,32], index: 13, kind: input, shape index: {}]   ;;  %s2434_s14 = inlined_call_operand.hbm [shape: f32[2,8,32], index: 14, kind: output, shape index: {}]  }
   0x1   :  { %2452 = sst [smem:[#allocation27_spill]] %s2433_s13 }
   0x2   :  { %2453 = sst [smem:[#allocation28_spill]] %s2434_s14 }
   0x3   :  { %19 = vsyncpa [#allocation5], 0 }
   0x4   :  { %20 = vsyncpa [#allocation8], 0 }
   0x5   :  { %21 = vsyncpa [#allocation11], 0 }
   0x6   :  { %22 = vsyncpa [#allocation6], 0 }
   0x7   :  { %24 = vsyncpa [#allocation6 + $0x1], 0  ;;  %s2046_s29 = smov 0   ;;  %s2048_s30 = smov 0  }
   0x8   :  { %s2050_s15 = smov 0   ;;  %s2052_s16 = smov 0  }
   0x9   :  { %s2054_s17 = smov 0   ;;  %s2056_s18 = smov 0  }
   0xa LB: > { %2454 = sst [smem:[#allocation18_spill]] %s1937_s29  ;;  %s1427_s19 = sadd.s32 4294967295, %s1957_s18   ;;  %s1957_s18 = sphi %s2056_s18, %s30_s18   ;;  %s1953_s17 = sphi %s2054_s17, %s2487_s17   ;;  %s1949_s16 = sphi %s2052_s16, %s2486_s16   ;;  %s1945_s15 = sphi %s2050_s15, %s2485_s15   ;;  %s1941_s30 = sphi %s2048_s30, %s2484_s30   ;;  %s1937_s29 = sphi %s2046_s29, %s2483_s29  }
   0xb   : > { %2455 = sst [smem:[#allocation19_spill]] %s1941_s30  ;;  %s1428_s20 = sadd.s32 4294967294, %s1957_s18  }
   0xc   : > { %2456 = sst [smem:[#allocation20_spill]] %s1945_s15  ;;  %s42_s21 = sadd.s32 1, %s1953_s17 }
   0xd   : > { %2457 = sst [smem:[#allocation21_spill]] %s1953_s17  ;;  %s350_s22 = sadd.s32 1, %s1945_s15 }
   0xe   : > { %2458 = sst [smem:[#allocation22_spill]] %s1957_s18  ;;  %p44_p0 = scmp.ge.s32.totalorder %s42_s21, 2 }
   0xf   : > { %p360_p1 = scmp.ne.s32.totalorder %s1945_s15, %s1941_s30  ;;  %p361_p2 = scmp.eq.s32.totalorder %s1427_s19, 1 }
  0x10   : > { %p366_p3 = scmp.ne.s32.totalorder %s1941_s30, %s1937_s29  ;;  %s2489_s21 = smov (%p44_p0, %s42_s21), 0 }
  0x11   : > { %2459 = sst [smem:[#allocation23_spill]] %s2489_s21  ;;  %p2086_p4 = por %p361_p2, %p360_p1 }
  0x12   : > { %p367_p5 = scmp.eq.s32.totalorder %s1428_s20, 1  ;;  %s345_s24 = ssub.s32 %s1953_s17, %s2489_s21 }
  0x13   : > { %s2460_s23 = scalar_select %p2086_p4, 1, 0 }
  0x14   : > { %p1429_p6 = scmp.ge.s32.totalorder %s1957_s18, 1  ;;  %p348_p7 = scmp.eq.s32.totalorder %s345_s24, 0 }
  0x15   : > { %2461 = sst [smem:[#allocation24_spill]] %s2460_s23  ;;  %p2093_p8 = por %p367_p5, %p366_p3 }
  0x16   : > { %p374_p9 = scmp.lt.s32.totalorder %s1957_s18, 3  ;;  %p2105_p11 = scmp.eq.s32.totalorder %s1427_s19, 0 }
  0x17   : > { %s2462_s25 = scalar_select %p2093_p8, 1, 0 }
  0x18   : > { %s2099_s26 = scalar_select %p348_p7, %s1945_s15, %s350_s22  }
  0x19   : > { %2463 = sst [smem:[#allocation25_spill]] %s2462_s25  ;;  %p2101_p10 = pnand %p1429_p6, %p374_p9 }
  0x1a   : > { %2464 = sst [smem:[#allocation26_spill]] %s2099_s26  ;;  %s1959_s20 = smov [#allocation7]  }
  0x1b   : > { %s2465_s27 = scalar_select %p2101_p10, 1, 0 }
  0x1c   : > { %s2466_s28 = scalar_select %p2105_p11, 1, 0 }
  0x1d   : > { %p1607_p12 = pneg %p2101_p10  ;;  %s411_s24 = sshll.u32 %s1959_s20, 4  ;;  %s412_s24 = int_to_ptr.vmem [resolvable:$true] %s411_s24 }
  0x1e   : > { %s1960_s22 = smov [#allocation10]   ;;  %s1727_s15 = scalar_lea.hbm %s2426_s6, 256 }
  0x1f   : > { %p2113_p13 = pnand %p2105_p11, %p1607_p12  ;;  %s436_s17 = sshll.u32 %s1960_s22, 4  ;;  %s2117_s17 = int_to_ptr.vmem [resolvable:$true] %s436_s17 }
  0x20   : > { %p1728_p0 = scmp.ne.s32.totalorder %s2426_s6, %s1727_s15  ;;  %p1734_p5 = scmp.lt.u32.totalorder %s1727_s15, %s2426_s6 }
  0x21   : > { %p2127_p1 = pneg %p2113_p13 }
  0x23   : > { %p1730_p2 = pnand %p2127_p1, %p1728_p0 }
  0x25   : > { %p1731_p3 = pneg %p1730_p2 }
  0x27   : > { %p1736_p6 = pnand %p1734_p5, %p1731_p3 }
  0x29   : > { %1739 = shalt.err (!%p1736_p6)
}
  0x2a   : > { %s1740_s26 = scalar_lea.vmem %s412_s24, 256  ;;  %p1748_p8 = scmp.lt.s32.totalorder %s412_s24, %s412_s24 }
  0x2b   : > { %p1741_p7 = scmp.ne.s32.totalorder %s412_s24, %s1740_s26  ;;  %p1749_p4 = scmp.lt.s32.totalorder %s1740_s26, %s1740_s26 }
  0x2d   : > { %p1743_p9 = pnand %p1741_p7, %p2127_p1  ;;  %p1750_p11 = por %p1749_p4, %p1748_p8 }
  0x2f   : > { %p1744_p12 = pneg %p1743_p9 }
  0x31   : > { %p1751_p10 = pnand %p1750_p11, %p1744_p12 }
  0x33   : > { %1754 = shalt.err (!%p1751_p10)
}
  0x34   : > { %s2450_s29 = smov 64   ;;  %s2451_s25 = smov 4  }
  0x35   : > { %1613 = dma.hbm_to_vmem [thread:$0]  (!%p2113_p13), %s2426_s6, 256, %s412_s24, [#allocation8], %s2450_s29, %s2450_s29, %s2451_s25  }
  0x36   : > { %s1755_s14 = scalar_lea.hbm %s2428_s8, 16 }
  0x37   : > { %p1756_p4 = scmp.ne.s32.totalorder %s2428_s8, %s1755_s14  ;;  %p1762_p11 = scmp.lt.u32.totalorder %s1755_s14, %s2428_s8 }
  0x39   : > { %p1758_p8 = pnand %p1756_p4, %p2127_p1 }
  0x3b   : > { %p1759_p10 = pneg %p1758_p8 }
  0x3d   : > { %p1764_p0 = pnand %p1762_p11, %p1759_p10 }
  0x3f   : > { %1767 = shalt.err (!%p1764_p0)
}
  0x40   : > { %s1768_s24 = scalar_lea.vmem %s2117_s17, 16  ;;  %s1775_s23 = scalar_lea.vmem %s2117_s17, 32 }
  0x41   : > { %p1769_p2 = scmp.ne.s32.totalorder %s2117_s17, %s1768_s24  ;;  %p1776_p6 = scmp.lt.s32.totalorder %s2117_s17, %s2117_s17 }
  0x42   : > { %p1777_p7 = scmp.lt.s32.totalorder %s1775_s23, %s1768_s24 }
  0x43   : > { %p1771_p3 = pnand %p1769_p2, %p2127_p1 }
  0x44   : > { %p1778_p9 = por %p1777_p7, %p1776_p6 }
  0x45   : > { %p1772_p5 = pneg %p1771_p3 }
  0x47   : > { %p1779_p12 = pnand %p1778_p9, %p1772_p5 }
  0x49   : > { %1782 = shalt.err (!%p1779_p12)
}
  0x4a   : > { %1619 = dma.hbm_to_vmem [thread:$0]  (!%p2113_p13), %s2428_s8, 16, %s2117_s17, [#allocation11]  }
  0x4b   : > { %s1963_s30 = smov [#allocation4]   ;;  %s1964_s18 = smov [#allocation9]  }
  0x4c   : > { %s398_s15 = sshll.u32 %s1963_s30, 4  ;;  %s425_s19 = sshll.u32 %s1964_s18, 4  ;;  %s399_s15 = int_to_ptr.vmem [resolvable:$true] %s398_s15  ;;  %s426_s19 = int_to_ptr.vmem [resolvable:$true] %s425_s19 }
  0x4d   : > { %s1783_s24 = scalar_lea.hbm %s2425_s5, 256 }
  0x4e   : > { %p1784_p4 = scmp.ne.s32.totalorder %s2425_s5, %s1783_s24  ;;  %p1790_p11 = scmp.lt.u32.totalorder %s1783_s24, %s2425_s5 }
  0x50   : > { %p1786_p8 = pnand %p1784_p4, %p2127_p1 }
  0x52   : > { %p1787_p10 = pneg %p1786_p8 }
  0x54   : > { %p1792_p0 = pnand %p1790_p11, %p1787_p10 }
  0x56   : > { %1795 = shalt.err (!%p1792_p0)
}
  0x57   : > { %s1796_s17 = scalar_lea.vmem %s399_s15, 256  ;;  %p1804_p6 = scmp.lt.s32.totalorder %s399_s15, %s399_s15 }
  0x58   : > { %p1797_p2 = scmp.ne.s32.totalorder %s399_s15, %s1796_s17  ;;  %p1805_p7 = scmp.lt.s32.totalorder %s1796_s17, %s1796_s17 }
  0x5a   : > { %p1799_p3 = pnand %p1797_p2, %p2127_p1  ;;  %p1806_p9 = por %p1805_p7, %p1804_p6 }
  0x5c   : > { %p1800_p5 = pneg %p1799_p3 }
  0x5e   : > { %p1807_p12 = pnand %p1806_p9, %p1800_p5 }
  0x60   : > { %1810 = shalt.err (!%p1807_p12)
}
  0x61   : > { %s2469_s29 = smov 4   ;;  %s2470_s14 = smov 64  }
  0x62   : > { %1610 = dma.hbm_to_vmem [thread:$0]  (!%p2113_p13), %s2425_s5, 256, %s399_s15, [#allocation5], %s2470_s14, %s2470_s14, %s2469_s29  }
  0x63   : > { %s1811_s26 = scalar_lea.hbm %s2427_s7, 16 }
  0x64   : > { %p1812_p4 = scmp.ne.s32.totalorder %s2427_s7, %s1811_s26  ;;  %p1818_p11 = scmp.lt.u32.totalorder %s1811_s26, %s2427_s7 }
  0x66   : > { %p1814_p8 = pnand %p1812_p4, %p2127_p1 }
  0x68   : > { %p1815_p10 = pneg %p1814_p8 }
  0x6a   : > { %p1820_p0 = pnand %p1818_p11, %p1815_p10 }
  0x6c   : > { %1823 = shalt.err (!%p1820_p0)
}
  0x6d   : > { %s1824_s25 = scalar_lea.vmem %s426_s19, 16  ;;  %s1831_s15 = scalar_lea.vmem %s426_s19, 32 }
  0x6e   : > { %p1825_p2 = scmp.ne.s32.totalorder %s426_s19, %s1824_s25  ;;  %p1832_p6 = scmp.lt.s32.totalorder %s426_s19, %s426_s19 }
  0x6f   : > { %p1833_p7 = scmp.lt.s32.totalorder %s1831_s15, %s1824_s25 }
  0x70   : > { %p1827_p3 = pnand %p1825_p2, %p2127_p1 }
  0x71   : > { %p1834_p9 = por %p1833_p7, %p1832_p6 }
  0x72   : > { %p1828_p5 = pneg %p1827_p3 }
  0x74   : > { %p1835_p12 = pnand %p1834_p9, %p1828_p5 }
  0x76   : > { %1838 = shalt.err (!%p1835_p12)
}
  0x77   : > { %1616 = dma.hbm_to_vmem [thread:$0]  (!%p2113_p13), %s2427_s7, 16, %s426_s19, [#allocation8]  }
  0x78   : > { %s1965_s30 = smov [#allocation12]   ;;  %s1839_s24 = scalar_lea.hbm %s2429_s9, 16 }
  0x79   : > { %s447_s18 = sshll.u32 %s1965_s30, 4  ;;  %p1840_p4 = scmp.ne.s32.totalorder %s2429_s9, %s1839_s24  ;;  %s448_s18 = int_to_ptr.vmem [resolvable:$true] %s447_s18 }
  0x7a   : > { %p1846_p11 = scmp.lt.u32.totalorder %s1839_s24, %s2429_s9 }
  0x7b   : > { %p1842_p8 = pnand %p1840_p4, %p2127_p1 }
  0x7d   : > { %p1843_p10 = pneg %p1842_p8 }
  0x7f   : > { %p1848_p0 = pnand %p1846_p11, %p1843_p10 }
  0x81   : > { %1851 = shalt.err (!%p1848_p0)
}
  0x82   : > { %s1852_s19 = scalar_lea.vmem %s448_s18, 16  ;;  %s1859_s15 = scalar_lea.vmem %s448_s18, 32 }
  0x83   : > { %p1853_p2 = scmp.ne.s32.totalorder %s448_s18, %s1852_s19  ;;  %p1860_p6 = scmp.lt.s32.totalorder %s448_s18, %s448_s18 }
  0x84   : > { %p1861_p7 = scmp.lt.s32.totalorder %s1859_s15, %s1852_s19 }
  0x85   : > { %p1855_p3 = pnand %p1853_p2, %p2127_p1 }
  0x86   : > { %p1862_p9 = por %p1861_p7, %p1860_p6 }
  0x87   : > { %p1856_p5 = pneg %p1855_p3 }
  0x89   : > { %p1863_p12 = pnand %p1862_p9, %p1856_p5 }
  0x8b   : > { %1866 = shalt.err (!%p1863_p12)
}
  0x8c   : > { %1622 = dma.hbm_to_vmem [thread:$0]  (!%p2113_p13), %s2429_s9, 16, %s448_s18, [#allocation11]  }
  0x8d   : > { %p2471_p4 = scmp.ne.s32.totalorder %s2465_s27, 0 }
  0x8e   : > { %p2472_p8 = scmp.ne.s32.totalorder (!%p2471_p4), %s2466_s28, 0 }
  0x8f   : > { %479 = sbr.rel (%p2471_p4) target bundleno = 2676 (0xa74), region = 76 }
  0x96   : > { %1920 = dma.done.wait (%p2472_p8), [#allocation5], 256  }
  0x97   : > { %1922 = vsyncadd (%p2472_p8), [#allocation5], 4294967040 }
  0x98   : > { %1924 = dma.done.wait (%p2472_p8), [#allocation8], 272  }
  0x99   : > { %1926 = vsyncadd (%p2472_p8), [#allocation8], 4294967024 }
  0x9a   : > { %1928 = dma.done.wait (%p2472_p8), [#allocation11], 32  }
  0x9b   : > { %1930 = vsyncadd (%p2472_p8), [#allocation11], 4294967264  ;;  %p540_p13 = scmp.lt.s32.totalorder %s1949_s16, 1  ;;  %vm552_vm0 = vcmask 261120   ;;  %v1697_v12 = vld [vmem:[%s2424_s4] sm:$0xff]   ;;  %v1698_v13 = vld [vmem:[#allocation4] sm:$0xff]  }
  0x9c   : > { %v1966_v14 = vmov 0.0   ;;  %v1699_v15 = vld [vmem:[%s2424_s4 + $0x8] sm:$0xff]   ;;  %v1700_v16 = vld [vmem:[#allocation4 + $0x8] sm:$0xff]   ;;  %vm1967_vm1 = vmmov 0   ;;  %v1444_v24 = vld [vmem:[%s2421_s1] ss:$0 sm:$0xff] }
  0x9d   : > { %s541_s21 = scalar_select %p540_p13, %s1949_s16, 1  ;;  %1509 = vmatprep.subr.bf16.mxu0 %v1966_v14  ;;  %1517 = vmatprep.subr.bf16.mxu1 %v1966_v14  ;;  %v1445_v26 = vld [vmem:[%s2422_s2] ss:$0 sm:$0xff]  ;;  %v1702_v34 = vld [vmem:[%s2423_s3 + $0x8] sm:$0xff]   ;;  %vm703_vm2 = vcmask 125952   ;;  %vm816_vm3 = vcmask 130048  }
  0x9e   : > { %1510 = vmatpush3.bf16.msra.mxu0 %v1697_v12  ;;  %1518 = vmatpush3.bf16.msra.mxu1 %v1698_v13  ;;  %v1701_v31 = vld [vmem:[%s2423_s3] sm:$0xff]   ;;  %vm941_vm4 = vcmask 1043456   ;;  %vm911_vm5 = vcmask 64512   ;;  %s2473_s14 = sld [smem:[#allocation19_spill]]  ;;  %vm1246_vm6 = vcmask 523264   ;;  %s2475_s28 = sld [smem:[#allocation24_spill]] }
  0x9f   : > { %s1443_s27 = sshll.u32 %s541_s21, 3  ;;  %1511 = vmatprep.subr.bf16.mxu0 %v1966_v14  ;;  %1519 = vmatprep.subr.bf16.mxu1 %v1966_v14  ;;  %s1968_s21 = smov 112  }
  0xa0   : > { %s543_s18 = scalar_lea.vmem %s2420_s0, %s1443_s27  ;;  %1513 = vmatprep.mubr.msk.bf16.mxu0 %vm1967_vm1, %v1966_v14  ;;  %1521 = vmatprep.mubr.msk.bf16.mxu1 %vm1967_vm1, %v1966_v14  ;;  %s1969_s27 = smov 16  }
  0xa1   : > { %v2246_v0 = vld [vmem:[%s543_s18] sm:$0xff]  ;;  %s2474_s18 = sld [smem:[#allocation27_spill]]  ;;  %s1478_s22 = sshll.u32 %s1949_s16, 7 }
  0xa2   : > { %v553_v1 = vsel %vm552_vm0, %v2246_v0, 0.0  ;;  %1512 = vmatpush3.bf16.msra.mxu0 %v1699_v15  ;;  %1520 = vmatpush3.bf16.msra.mxu1 %v1700_v16  ;;  %s2476_s17 = sld [smem:[#allocation28_spill]]  ;;  %s1970_s29 = smov [#allocation13]  }
  0xa3   : > { %554 = vadd.xlane.f32.xlu0 %v553_v1  ;;  %1525 = vmatprep.subr.bf16.mxu0 %v1966_v14 }
  0xa4   : > { %1533 = vmatprep.subr.bf16.mxu1 %v1966_v14  ;;  %p2478_p10 = scmp.ne.s32.totalorder %s2475_s28, 0 }
  0xa7   : > { %721 = vadd.xlane.f32.xlu0 %v553_v1 }
  0xa8   : > { %s2477_s25 = smov %s2476_s17  ;;  %s2372_s19 = scalar_lea.hbm %s2476_s17, %s1478_s22 }
 0x130   : > { %v555_v2 = vpop.xlane.xlu0 %554 }
 0x131   : > { %v557_v3 = vmul.f32 0.03125, %v555_v2 }
 0x133   : > { %v558_v4 = vsub.f32 %v2246_v0, %v557_v3 }
 0x134   : > { %v722_v5 = vpop.xlane.xlu0 %721 }
 0x135   : > { %v724_v6 = vmul.f32 0.03125, %v722_v5  ;;  %v559_v7 = vmul.f32 %v558_v4, %v558_v4 }
 0x137   : > { %v725_v8 = vsub.f32 %v2246_v0, %v724_v6  ;;  %v560_v9 = vsel %vm552_vm0, %v559_v7, 0.0 }
 0x138   : > { %561 = vadd.xlane.f32.xlu1 %v560_v9 }
 0x139   : > { %v726_v10 = vmul.f32 %v725_v8, %v725_v8 }
 0x13b   : > { %v727_v11 = vsel %vm552_vm0, %v726_v10, 0.0 }
 0x13c   : > { %728 = vadd.xlane.f32.xlu1 %v727_v11 }
 0x1c5   : > { %v562_v17 = vpop.xlane.xlu1 %561 }
 0x1c6   : > { %v563_v18 = vmul.f32 0.03125, %v562_v17 }
 0x1c8   : > { %v564_v19 = vadd.f32 1e-05, %v563_v18 }
 0x1c9   : > { %v729_v20 = vpop.xlane.xlu1 %728 }
 0x1ca   : > { %1711 = vrsqrt.f32 %v564_v19  ;;  %v730_v21 = vmul.f32 0.03125, %v729_v20 }
 0x1cc   : > { %v731_v22 = vadd.f32 1e-05, %v730_v21 }
 0x1ce   : > { %1713 = vrsqrt.f32 %v731_v22 }
 0x1d4   : > { %v1712_v23 = vpop.eup %1711 }
 0x1d5   : > { %v566_v25 = vmul.f32 %v1712_v23, %v558_v4 }
 0x1d7   : > { %v573_v27 = vmul.f32 %v1444_v24, %v566_v25 }
 0x1d8   : > { %v1714_v28 = vpop.eup %1713 }
 0x1d9   : > { %v733_v29 = vmul.f32 %v1714_v28, %v725_v8  ;;  %v580_v30 = vadd.f32 %v1445_v26, %v573_v27 }
 0x1db   : > { %v581_v32 = vpack.c.bf16 %v580_v30, %v580_v30  ;;  %v740_v33 = vmul.f32 %v1444_v24, %v733_v29 }
 0x1dd   : > { %1514 = vmatmul.mubr.msk.bf16.vlgmr.msra.gmra.mrb[0].mxu0 %vm552_vm0, %v581_v32  ;;  %1522 = vmatmul.mubr.msk.bf16.vlgmr.msra.gmra.mrb[0].mxu1 %vm552_vm0, %v581_v32  ;;  %v747_v35 = vadd.f32 %v1445_v26, %v740_v33 }
 0x1de   : > { %1526 = vmatpush3.bf16.msra.mxu0 %v1701_v31  ;;  %1529 = vmatprep.mubr.msk.bf16.mxu0 %vm1967_vm1, %v1966_v14 }
 0x1df   : > { %1527 = vmatprep.subr.bf16.mxu0 %v1966_v14  ;;  %1535 = vmatprep.mubr.msk.bf16.mxu1 %vm1967_vm1, %v1966_v14  ;;  %v748_v36 = vpack.c.bf16 %v747_v35, %v747_v35  ;;  %v1704_v35 = vld [vmem:[#allocation7 + $0x8] sm:$0xff]  }
 0x1e2   : > { %1528 = vmatpush3.bf16.msra.mxu0 %v1702_v34  ;;  %v1703_v34 = vld [vmem:[#allocation7] sm:$0xff]  }
 0x1e3   : > { %1539 = vmatprep.subr.bf16.mxu0 %v1966_v14 }
 0x1e5   : > { %1530 = vmatmul.mubr.msk.bf16.vlgmr.msra.gmra.mrb[4].mxu0 %vm552_vm0, %v748_v36 }
 0x1e6   : > { %1541 = vmatprep.mubr.msk.bf16.mxu0 %vm1967_vm1, %v1966_v14 }
 0x2b0   : > { %v635_v37 = vpop.f32.mrb[0].mxu0  ;;  %v691_v38 = vpop.f32.mrb[0].mxu1 }
 0x2b1   : > { %v701_v39 = vpack.c.bf16 %v635_v37, %v635_v37  ;;  %v710_v40 = vpack.c.bf16 %v691_v38, %v691_v38  ;;  %v1523_v41 = vpop.f32.mrb[1].mxu1  ;;  %698 = vrot.lane.b32.xlu0 %v635_v37, %s1968_s21  ;;  %v1515_v42 = vpop.f32.mrb[1].mxu0 }
 0x2b2   : > { %v638_v43 = vpop.f32.mrb[2].mxu0  ;;  %v694_v44 = vpop.f32.mrb[2].mxu1 }
 0x2b3   : > { %704 = vst.msk [vmem:[#allocation2] sm:$0xf] %vm703_vm2, %v701_v39  ;;  %712 = vst.msk [vmem:[#allocation3] sm:$0xf] %vm703_vm2, %v710_v40  ;;  %v1516_v45 = vpop.f32.mrb[3].mxu0  ;;  %v1524_v46 = vpop.f32.mrb[3].mxu1 }
 0x2b8   : > { %v802_v47 = vpop.f32.mrb[4].mxu0 }
 0x2b9   : > { %809 = vrot.lane.b32.xlu1 %v802_v47, %s1968_s21  ;;  %v1531_v48 = vpop.f32.mrb[5].mxu0  ;;  %v812_v54 = vpack.c.bf16 %v802_v47, %v802_v47  ;;  %v1461_v47 = vld [vmem:[#allocation9] ss:$0 sm:$0xff] }
 0x2ba   : > { %v805_v49 = vpop.f32.mrb[6].mxu0  ;;  %v814_v50 = vld [vmem:[#allocation2] sm:$0xf]  ;;  %v936_v53 = vld [vmem:[#allocation3] sm:$0xf] }
 0x2bb   : > { %v1532_v51 = vpop.f32.mrb[7].mxu0  ;;  %v821_v52 = vsel %vm816_vm3, %v814_v50, 0  ;;  %v943_v55 = vsel %vm941_vm4, %v936_v53, 0 }
 0x2bc   : > { %1534 = vmatpush3.bf16.xpose.msra.mxu1 %v821_v52 }
 0x2bd   : > { %1545 = vmatprep.subr.bf16.mxu1 %v1966_v14 }
 0x2c3   : > { %1536 = vmatmul.mubr.msk.bf16.vlgmr.msra.gmra.mrb[4].mxu1 %vm816_vm3, %v812_v54 }
 0x2c4   : > { %1546 = vmatpush3.bf16.msra.mxu1 %v943_v55  ;;  %1547 = vmatprep.mubr.msk.bf16.mxu1 %vm1967_vm1, %v1966_v14 }
 0x2c5   : > { %1557 = vmatprep.subr.bf16.mxu1 %v1966_v14 }
 0x323   : > { %v699_v56 = vpop.permute.xlu0 %698 }
 0x324   : > { %v702_v57 = vpack.c.bf16 %v699_v56, %v699_v56 }
 0x326   : > { %705 = vst.msk [vmem:[#allocation2 + $0x4] sm:$0xf] %vm703_vm2, %v702_v57 }
 0x32b   : > { %v810_v60 = vpop.permute.xlu1 %809 }
 0x32c   : > { %v813_v61 = vpack.c.bf16 %v810_v60, %v810_v60  ;;  %v1705_v60 = vld [vmem:[%s2430_s10] sm:$0xff]  }
 0x32d   : > { %v815_v58 = vld [vmem:[#allocation2 + $0x4] sm:$0xf] }
 0x32e   : > { %v867_v59 = vsel %vm816_vm3, %v815_v58, 0 }
 0x32f   : > { %1540 = vmatpush3.bf16.xpose.msra.mxu0 %v867_v59 }
 0x330   : > { %1551 = vmatprep.subr.bf16.mxu0 %v1966_v14 }
 0x336   : > { %1542 = vmatmul.mubr.msk.bf16.vlgmr.msra.gmra.mrb[8].mxu0 %vm816_vm3, %v813_v61 }
 0x337   : > { %1553 = vmatprep.mubr.msk.bf16.mxu0 %vm1967_vm1, %v1966_v14 }
 0x396   : > { %v857_v62 = vpop.f32.mrb[4].mxu1 }
 0x397   : > { %v909_v63 = vmul.f32 0.25, %v857_v62  ;;  %v1537_v1 = vpop.f32.mrb[5].mxu1 }
 0x398   : > { %v860_v2 = vpop.f32.mrb[6].mxu1 }
 0x399   : > { %v1538_v3 = vpop.f32.mrb[7].mxu1  ;;  %v912_v4 = vsel %vm911_vm5, %v909_v63, -inf  ;;  %v1465_v2 = vld [vmem:[#allocation10] ss:$0 sm:$0xff] }
 0x39a   : > { %913 = vmax.xlane.f32.xlu0 %v912_v4  ;;  %v1466_v4 = vld [vmem:[#allocation12] ss:$0 sm:$0xff] }
 0x409   : > { %v903_v5 = vpop.f32.mrb[8].mxu0 }
 0x40a   : > { %v910_v6 = vmul.f32 0.25, %v903_v5  ;;  %v1543_v7 = vpop.f32.mrb[9].mxu0 }
 0x40b   : > { %v906_v8 = vpop.f32.mrb[10].mxu0 }
 0x40c   : > { %v1544_v9 = vpop.f32.mrb[11].mxu0  ;;  %v915_v10 = vsel %vm911_vm5, %v910_v6, -inf  ;;  %v1707_v8 = vld [vmem:[%s2432_s12] sm:$0xff]  }
 0x40d   : > { %916 = vmax.xlane.f32.xlu1 %v915_v10  ;;  %v1708_v9 = vld [vmem:[%s2432_s12 + $0x8] sm:$0xff]   ;;  %v1709_v10 = vld [vmem:[%s2432_s12 + $0x10] sm:$0xff]  }
 0x41e   : > { %707 = vrot.lane.b32.xlu1 %v691_v38, %s1968_s21  ;;  %s537_s21 = sand.u32 1, %s2473_s14   ;;  %s1871_s14 = sshll.u32 %s1970_s29, 4  ;;  %s1872_s14 = int_to_ptr.vmem [resolvable:$false] %s1871_s14 }
 0x41f   : > { %s1293_s16 = scalar_lea.sflag [#allocation6], %s537_s21 }
 0x427   : > { %v914_v11 = vpop.xlane.xlu0 %913 }
 0x428   : > { %v918_v12 = vsub.f32 %v909_v63, %v914_v11  ;;  %v1710_v11 = vld [vmem:[%s2432_s12 + $0x18] sm:$0xff]  }
 0x42a   : > { %v920_v16 = vmul.f32 1.442695, %v918_v12  ;;  %v1467_v12 = vld [vmem:[%s2431_s11] ss:$0 sm:$0xff] }
 0x49a   : > { %v917_v13 = vpop.xlane.xlu1 %916 }
 0x49b   : > { %v919_v15 = vsub.f32 %v910_v6, %v917_v13 }
 0x49d   : > { %v922_v17 = vmul.f32 1.442695, %v919_v15 }
 0x49e   : > { %v708_v18 = vpop.permute.xlu1 %707 }
 0x49f   : > { %1715 = vpow2.f32 %v922_v17  ;;  %v711_v19 = vpack.c.bf16 %v708_v18, %v708_v18 }
 0x4a0   : > { %1717 = vpow2.f32 %v920_v16 }
 0x4a1   : > { %713 = vst.msk [vmem:[#allocation3 + $0x4] sm:$0xf] %vm703_vm2, %v711_v19 }
 0x4a8   : > { %v937_v20 = vld [vmem:[#allocation3 + $0x4] sm:$0xf] }
 0x4a9   : > { %v1716_v21 = vpop.eup %1715  ;;  %v989_v22 = vsel %vm941_vm4, %v937_v20, 0 }
 0x4aa   : > { %1552 = vmatpush3.bf16.msra.mxu0 %v989_v22  ;;  %v927_v23 = vsel %vm911_vm5, %v1716_v21, 0.0  ;;  %v1718_v24 = vpop.eup %1717 }
 0x4ab   : > { %928 = vadd.xlane.f32.xlu0 %v927_v23  ;;  %1565 = vmatprep.subr.bf16.mxu0 %v1966_v14  ;;  %v924_v25 = vsel %vm911_vm5, %v1718_v24, 0.0 }
 0x4af   : > { %925 = vadd.xlane.f32.xlu0 %v924_v25 }
 0x538   : > { %v929_v26 = vpop.xlane.xlu0 %928 }
 0x539   : > { %1719 = vrcp.f32 %v929_v26 }
 0x53c   : > { %v926_v27 = vpop.xlane.xlu0 %925 }
 0x53d   : > { %1721 = vrcp.f32 %v926_v27 }
 0x543   : > { %v1720_v28 = vpop.eup %1719 }
 0x544   : > { %v933_v29 = vmul.f32 %v1720_v28, %v1716_v21 }
 0x546   : > { %v935_v30 = vpack.c.bf16 %v933_v29, %v933_v29 }
 0x547   : > { %v1722_v31 = vpop.eup %1721 }
 0x548   : > { %v932_v32 = vmul.f32 %v1722_v31, %v1718_v24  ;;  %1554 = vmatmul.mubr.msk.bf16.vlgmr.msra.gmra.mrb[12].mxu0 %vm911_vm5, %v935_v30  ;;  %v1471_v24 = vld [vmem:[%s2474_s18] ss:$0 sm:$0xff] }
 0x549   : > { %1569 = vmatprep.mubr.msk.bf16.mxu0 %vm1967_vm1, %v1966_v14  ;;  %1566 = vmatpush3.bf16.msra.mxu0 %v1705_v60 }
 0x54a   : > { %v934_v33 = vpack.c.bf16 %v932_v32, %v932_v32  ;;  %1567 = vmatprep.subr.bf16.mxu0 %v1966_v14 }
 0x54c   : > { %1548 = vmatmul.mubr.msk.bf16.vlgmr.msra.gmra.mrb[8].mxu1 %vm911_vm5, %v934_v33 }
 0x54d   : > { %1561 = vmatprep.mubr.msk.bf16.mxu1 %vm1967_vm1, %v1966_v14  ;;  %1558 = vmatpush3.bf16.msra.mxu1 %v1703_v34 }
 0x54e   : > { %1559 = vmatprep.subr.bf16.mxu1 %v1966_v14 }
 0x551   : > { %1560 = vmatpush3.bf16.msra.mxu1 %v1704_v35 }
 0x552   : > { %1573 = vmatprep.subr.bf16.mxu1 %v1966_v14 }
 0x61b   : > { %v1025_v36 = vpop.f32.mrb[12].mxu0 }
 0x61c   : > { %1032 = vrot.lane.b32.xlu0 %v1025_v36, %s1969_s27  ;;  %v1555_v37 = vpop.f32.mrb[13].mxu0  ;;  %s1442_s27 = sshll.u32 %s537_s21, 3 }
 0x61d   : > { %v1028_v38 = vpop.f32.mrb[14].mxu0  ;;  %s539_s26 = scalar_lea.vmem [#allocation13], %s1442_s27  ;;  %s1873_s27 = scalar_lea.vmem %s1872_s14, 256 }
 0x61e   : > { %v1556_v39 = vpop.f32.mrb[15].mxu0  ;;  %s1307_s24 = sshll.u32 %s539_s26, 4  ;;  %s2374_s24 = int_to_ptr.vmem [resolvable:$true] %s1307_s24 }
 0x61f   : > { %v979_v40 = vpop.f32.mrb[8].mxu1  ;;  %s1867_s15 = scalar_lea.vmem %s2374_s24, 128  ;;  %p1874_p2 = scmp.lt.s32.totalorder %s2374_s24, %s1872_s14 }
 0x620   : > { %v1549_v41 = vpop.f32.mrb[9].mxu1  ;;  %p1868_p1 = scmp.ne.s32.totalorder %s2374_s24, %s1867_s15  ;;  %p1875_p3 = scmp.lt.s32.totalorder %s1873_s27, %s1867_s15 }
 0x621   : > { %v982_v42 = vpop.f32.mrb[10].mxu1 }
 0x622   : > { %v1550_v43 = vpop.f32.mrb[11].mxu1  ;;  %p1869_p11 = pnand %p1868_p1, %p2478_p10  ;;  %p1876_p5 = por %p1875_p3, %p1874_p2 }
 0x624   : > { %p1870_p0 = pneg %p1869_p11 }
 0x626   : > { %p1877_p6 = pnand %p1876_p5, %p1870_p0 }
 0x68e   : > { %v1033_v44 = vpop.permute.xlu0 %1032 }
 0x68f   : > { %v1035_v45 = vsel %vm816_vm3, %v979_v40, %v1033_v44 }
 0x690   : > { %v1036_v46 = vpack.c.bf16 %v1035_v45, %v1035_v45 }
 0x692   : > { %1562 = vmatmul.mubr.msk.bf16.vlgmr.msra.gmra.mrb[12].mxu1 %vm552_vm0, %v1036_v46 }
 0x693   : > { %1581 = vmatprep.mubr.msk.bf16.mxu1 %vm1967_vm1, %v1966_v14  ;;  %1574 = vmatpush3.bf16.msra.mxu1 %v1707_v8 }
 0x694   : > { %1575 = vmatprep.subr.bf16.mxu1 %v1966_v14 }
 0x697   : > { %1576 = vmatpush3.bf16.msra.mxu1 %v1708_v9 }
 0x698   : > { %1577 = vmatprep.subr.bf16.mxu1 %v1966_v14 }
 0x69b   : > { %1578 = vmatpush3.bf16.msra.mxu1 %v1709_v10 }
 0x69c   : > { %1579 = vmatprep.subr.bf16.mxu1 %v1966_v14 }
 0x69f   : > { %1580 = vmatpush3.bf16.msra.mxu1 %v1710_v11 }
 0x765   : > { %v1097_v48 = vpop.f32.mrb[12].mxu1 }
 0x766   : > { %v1098_v49 = vadd.f32 %v1461_v47, %v1097_v48  ;;  %v1563_v50 = vpop.f32.mrb[13].mxu1 }
 0x767   : > { %v1100_v51 = vpop.f32.mrb[14].mxu1 }
 0x768   : > { %v2331_v52 = vadd.f32 %v1098_v49, %v2246_v0  ;;  %v1564_v53 = vpop.f32.mrb[15].mxu1  ;;  %v1706_v0 = vld [vmem:[%s2430_s10 + $0x8] sm:$0xff]  }
 0x769   : > { %1568 = vmatpush3.bf16.msra.mxu0 %v1706_v0 }
 0x76a   : > { %v1106_v54 = vsel %vm552_vm0, %v2331_v52, 0.0 }
 0x76b   : > { %1107 = vadd.xlane.f32.xlu1 %v1106_v54 }
 0x7f8   : > { %v1108_v55 = vpop.xlane.xlu1 %1107 }
 0x7f9   : > { %v1109_v56 = vmul.f32 0.03125, %v1108_v55 }
 0x7fb   : > { %v1110_v57 = vsub.f32 %v2331_v52, %v1109_v56 }
 0x7fd   : > { %v1111_v58 = vmul.f32 %v1110_v57, %v1110_v57 }
 0x7ff   : > { %v1112_v59 = vsel %vm552_vm0, %v1111_v58, 0.0 }
 0x800   : > { %1113 = vadd.xlane.f32.xlu0 %v1112_v59 }
 0x88d   : > { %v1114_v61 = vpop.xlane.xlu0 %1113 }
 0x88e   : > { %v1115_v62 = vmul.f32 0.03125, %v1114_v61 }
 0x890   : > { %v1116_v63 = vadd.f32 1e-05, %v1115_v62 }
 0x892   : > { %1723 = vrsqrt.f32 %v1116_v63 }
 0x89c   : > { %v1724_v1 = vpop.eup %1723 }
 0x89d   : > { %v1118_v3 = vmul.f32 %v1724_v1, %v1110_v57 }
 0x89f   : > { %v1125_v5 = vmul.f32 %v1465_v2, %v1118_v3 }
 0x8a1   : > { %v1132_v6 = vadd.f32 %v1466_v4, %v1125_v5 }
 0x8a3   : > { %v1133_v7 = vpack.c.bf16 %v1132_v6, %v1132_v6 }
 0x8a5   : > { %1570 = vmatmul.mubr.msk.bf16.vlgmr.msra.gmra.mrb[16].mxu0 %vm552_vm0, %v1133_v7 }
 0x978   : > { %v1194_v13 = vpop.f32.mrb[16].mxu0 }
 0x979   : > { %v1195_v15 = vadd.f32 %v1467_v12, %v1194_v13  ;;  %v1571_v16 = vpop.f32.mrb[17].mxu0 }
 0x97a   : > { %v1197_v17 = vpop.f32.mrb[18].mxu0 }
 0x97b   : > { %v1202_v18 = vmul.f32 0.70710677, %v1195_v15  ;;  %v1572_v19 = vpop.f32.mrb[19].mxu0  ;;  %v1200_v14 = vmul.f32 0.5, %v1195_v15 }
 0x97d   : > { %1725 = verf.f32 %v1202_v18 }
 0x987   : > { %v1726_v20 = vpop.eup %1725 }
 0x988   : > { %v1204_v21 = vadd.f32 1.0, %v1726_v20 }
 0x98a   : > { %v1205_v22 = vmul.f32 %v1204_v21, %v1200_v14 }
 0x98c   : > { %v1206_v23 = vpack.c.bf16 %v1205_v22, %v1205_v22 }
 0x98e   : > { %1582 = vmatmul.mubr.msk.bf16.vlgmr.msra.gmra.mrb[16].mxu1 %vm1246_vm6, %v1206_v23 }
 0xa61   : > { %v1284_v25 = vpop.f32.mrb[16].mxu1 }
 0xa62   : > { %v1285_v26 = vadd.f32 %v1471_v24, %v1284_v25  ;;  %v1583_v27 = vpop.f32.mrb[17].mxu1 }
 0xa63   : > { %v1287_v28 = vpop.f32.mrb[18].mxu1 }
 0xa64   : > { %v1290_v29 = vadd.f32 %v1285_v26, %v2331_v52  ;;  %v1584_v30 = vpop.f32.mrb[19].mxu1 }
 0xa66   : > { %1291 = vst.msk [vmem:[%s539_s26] sm:$0xff] %vm552_vm0, %v1290_v29 }
 0xa67   : > { %1880 = shalt.err (!%p1877_p6)
}
 0xa68   : > { %s1881_s21 = scalar_lea.hbm %s2372_s19, 128  ;;  %s1885_s18 = scalar_lea.hbm %s2477_s25, 256 }
 0xa69   : > { %p1882_p7 = scmp.ne.s32.totalorder %s2372_s19, %s1881_s21  ;;  %p1886_p4 = scmp.lt.u32.totalorder %s2372_s19, %s2477_s25 }
 0xa6a   : > { %p1887_p8 = scmp.lt.u32.totalorder %s1885_s18, %s1881_s21  ;;  %p1889_p1 = scmp.lt.u32.totalorder %s1881_s21, %s2372_s19 }
 0xa6b   : > { %p1883_p9 = pnand %p1882_p7, %p2478_p10 }
 0xa6c   : > { %p1888_p13 = por %p1887_p8, %p1886_p4 }
 0xa6d   : > { %p1884_p12 = pneg %p1883_p9 }
 0xa6e   : > { %p1890_p11 = por %p1889_p1, %p1888_p13 }
 0xa70   : > { %p1891_p0 = pnand %p1890_p11, %p1884_p12 }
 0xa72   : > { %1894 = shalt.err (!%p1891_p0)
}
 0xa73   : > { %1605 = dma.vmem_to_hbm [thread:$0]  (%p2478_p10), %s2374_s24, 128, %s2372_s19, %s1293_s16  }
 0xa74 PF: > { %s2479_s23 = sld [smem:[#allocation22_spill]]  ;;  %s2480_s13 = sld [smem:[#allocation18_spill]] }
 0xa75   : > { %s2481_s17 = sld [smem:[#allocation25_spill]] }
 0xa7a   : > { %p1637_p2 = scmp.ge.s32.totalorder %s2479_s23, 2  ;;  %s1319_s15 = sand.u32 1, %s2480_s13  }
 0xa7b   : > { %p2482_p3 = scmp.ne.s32.totalorder %s2481_s17, 0  ;;  %s1320_s29 = scalar_lea.sflag [#allocation6], %s1319_s15 }
 0xa7d   : > { %p1624_p5 = pnand %p1637_p2, %p2482_p3 }
 0xa7f   : > { %1932 = dma.done.wait (!%p1624_p5), %s1320_s29, 128  }
 0xa80   : > { %1934 = vsyncadd (!%p1624_p5), %s1320_s29, 4294967168  ;;  %s30_s18 = sadd.s32 1, %s2479_s23   ;;  %s2483_s29 = sld [smem:[#allocation19_spill]] }
 0xa81   : > { %p27_p6 = scmp.ge.s32.totalorder %s30_s18, 4   ;;  %s2484_s30 = sld [smem:[#allocation20_spill]] }
 0xa82   : > { %s2485_s15 = sld [smem:[#allocation26_spill]]  ;;  %s2486_s16 = sld [smem:[#allocation21_spill]] }
 0xa83   : > { %s2487_s17 = sld [smem:[#allocation23_spill]]  ;;  %29 = sbr.rel (!%p27_p6) target bundleno = 10 (0xa), region = 137 }
 0xa8a   :  { %1325 = vsyncpa [#allocation5], 1 }
 0xa8b   :  { %1327 = vsyncpa [#allocation5 + $0x1], 1 }
 0xa8c   :  { %1328 = vsyncpa [#allocation8], 1 }
 0xa8d   :  { %1329 = vsyncpa [#allocation11], 1 }
 0xa8e   :  { %1330 = vsyncpa [#allocation6], 1 }
 0xa8f   :  { %1332 = vsyncpa [#allocation6 + $0x1], 1 }

</bundles_post_ra>
